<compile_context>
chip_gen: v5e
topology: v5e:2x2
jax: 0.10.0
libtpu: 0.0.40
codegen_flags: <defaults>
</compile_context>

<pallas_src>
import jax
import jax.numpy as jnp
from jax.experimental import pallas as pl
from jax.experimental.pallas import tpu as pltpu


def _critic_kernel(x_ref, w1_ref, b1_ref, w2_ref, b2_ref, w3_ref, b3_ref, o_ref):
    # In-kernel f32 -> bf16 cast of the streamed x tile (saves a wrapper-side
    # full HBM cast pass; the VPU cast is hidden under the matmuls).
    x = x_ref[...].astype(jnp.bfloat16)

    # Layer 1: bf16 MXU matmul with f32 accumulation; bias + ReLU in f32 (VPU).
    h1 = jnp.dot(x, w1_ref[...], preferred_element_type=jnp.float32)
    h1 = jnp.maximum(h1 + b1_ref[...], 0.0)

    # Layer 2: re-cast the f32 activations to bf16 only for the MXU operand.
    h2 = jnp.dot(h1.astype(jnp.bfloat16), w2_ref[...],
                 preferred_element_type=jnp.float32)
    h2 = jnp.maximum(h2 + b2_ref[...], 0.0)

    # Layer 3 (out_features == 1): kept off the MXU.  VPU broadcast-multiply by
    # the w3 row, XLU lane reduction, then the SMEM scalar bias.
    v = jnp.sum(h2 * w3_ref[...], axis=-1, keepdims=True) + b3_ref[0]   # (TB, 1)

    # Lane-dense store: repack the (TB, 1) column into the (1, 8, TB//8) output
    # slab.  Avoids 1-of-128-lane masked vst and 128x-padded output buffers.
    o_ref[...] = jnp.reshape(v, o_ref.shape).astype(o_ref.dtype)


def _round_up(a, m):
    return (a + m - 1) // m * m


def _choose_tile_batch(B, tile_batch):
    """Batch tile: multiple of 8 (sublane), capped at tile_batch, and no larger
    than ceil(B/2) rounded up so there are >= 2 grid steps whenever B allows it
    (lets dimension_semantics=("parallel",) feed both v7x TensorCores)."""
    tile_batch = max(8, _round_up(tile_batch, 8))
    half = _round_up(max(1, -(-B // 2)), 8)
    return min(tile_batch, half)


def basic_critic_forward(state, params, *, tile_batch=4096):
    """state: [B, obs] float32.  params: dict of (w1,b1,w2,b2,w3,b3)."""
    B, obs = state.shape
    h1d = params["w1"].shape[1]
    h2d = params["w2"].shape[1]

    # x stays f32 (cast to bf16 inside the kernel); MXU weights in bf16,
    # everything elementwise in f32.
    x = state if state.dtype == jnp.float32 else state.astype(jnp.float32)
    w1 = params["w1"].astype(jnp.bfloat16)
    w2 = params["w2"].astype(jnp.bfloat16)
    b1 = params["b1"].reshape(1, h1d).astype(jnp.float32)
    b2 = params["b2"].reshape(1, h2d).astype(jnp.float32)
    w3 = params["w3"].reshape(1, h2d).astype(jnp.float32)   # row for VPU broadcast
    b3 = params["b3"].reshape(1).astype(jnp.float32)         # scalar, lives in SMEM

    TB = _choose_tile_batch(B, tile_batch)
    num_tiles = -(-B // TB)          # ceil-div; last x block may be partial (ragged B)

    const2 = lambda i: (0, 0)        # weights/biases: same block every step -> resident

    out = pl.pallas_call(
        _critic_kernel,
        # Lane-dense output: one (8, TB//8) slab per tile; reshaped to (B,1) below.
        out_shape=jax.ShapeDtypeStruct((num_tiles, 8, TB // 8), jnp.float32),
        grid=(num_tiles,),
        in_specs=[
            pl.BlockSpec((TB, obs), lambda i: (i, 0)),            # x: streamed per tile (f32)
            pl.BlockSpec((obs, h1d), const2),                     # w1
            pl.BlockSpec((1, h1d), const2),                       # b1
            pl.BlockSpec((h1d, h2d), const2),                     # w2
            pl.BlockSpec((1, h2d), const2),                       # b2
            pl.BlockSpec((1, h2d), const2),                       # w3 (row)
            pl.BlockSpec(memory_space=pltpu.MemorySpace.SMEM),    # b3 scalar
        ],
        out_specs=pl.BlockSpec((1, 8, TB // 8), lambda i: (i, 0, 0)),
        compiler_params=pltpu.CompilerParams(
            dimension_semantics=("parallel",),
            vmem_limit_bytes=32 * 1024 * 1024),
    )(x, w1, b1, w2, b2, w3, b3)

    # Rows beyond B come from undefined partial-block reads; slice them off.
    return out.reshape(num_tiles * TB, 1)[:B]


def init_params(key, observation_space, hiddens=(64, 32)):
    """PyTorch-style uniform(-1/sqrt(fan_in), 1/sqrt(fan_in)) init.
    Weights are stored as [in, out] (already transposed for x @ W)."""
    dims = [observation_space, hiddens[0], hiddens[1], 1]
    params = {}
    for i in range(3):
        fan_in, fan_out = dims[i], dims[i + 1]
        key, kw, kb = jax.random.split(key, 3)
        bound = 1.0 / jnp.sqrt(jnp.float32(fan_in))
        params[f"w{i+1}"] = jax.random.uniform(
            kw, (fan_in, fan_out), jnp.float32, -bound, bound)
        params[f"b{i+1}"] = jax.random.uniform(
            kb, (1, fan_out), jnp.float32, -bound, bound)
    return params


def _ref_bf16(x, p):
    """Reference emulating the kernel's bf16 MXU operands with f32 accumulation."""
    hi = jax.lax.Precision.HIGHEST
    xb = x.astype(jnp.bfloat16).astype(jnp.float32)
    w1b = p["w1"].astype(jnp.bfloat16).astype(jnp.float32)
    w2b = p["w2"].astype(jnp.bfloat16).astype(jnp.float32)
    h1 = jnp.maximum(jnp.dot(xb, w1b, precision=hi) + p["b1"], 0.0)
    h1b = h1.astype(jnp.bfloat16).astype(jnp.float32)
    h2 = jnp.maximum(jnp.dot(h1b, w2b, precision=hi) + p["b2"], 0.0)
    return jnp.dot(h2, p["w3"], precision=hi) + p["b3"]


def _ref_f32(x, p):
    """Pure f32 PyTorch-equivalent forward."""
    hi = jax.lax.Precision.HIGHEST
    h1 = jnp.maximum(jnp.dot(x, p["w1"], precision=hi) + p["b1"], 0.0)
    h2 = jnp.maximum(jnp.dot(h1, p["w2"], precision=hi) + p["b2"], 0.0)
    return jnp.dot(h2, p["w3"], precision=hi) + p["b3"]


if __name__ == "__main__":
    key = jax.random.PRNGKey(0)
    key, k_state = jax.random.split(key)

    batch = 10                 # not a multiple of 8 -> exercises the ragged-B path
    observation_space = 32
    hiddens = (64, 32)

    state = jax.random.normal(k_state, (batch, observation_space), jnp.float32)
    params = init_params(key, observation_space, hiddens)

    v = basic_critic_forward(state, params)
    jax.block_until_ready(v)
    assert v.shape == (batch, 1)

    # bf16-operand reference (tight tolerance) and pure-f32 reference (loose,
    # accounts for the deliberate bf16 cast of the MXU operands).
    assert jnp.allclose(v, _ref_bf16(state, params), atol=2e-3, rtol=2e-3)
    assert jnp.allclose(v, _ref_f32(state, params), atol=3e-2, rtol=3e-2)

    # Second shape: multi-tile + partial last block with TB > 8 (lane-dense slab path).
    batch2 = 300
    state2 = jax.random.normal(jax.random.PRNGKey(1),
                               (batch2, observation_space), jnp.float32)
    v2 = basic_critic_forward(state2, params, tile_batch=128)
    jax.block_until_ready(v2)
    assert v2.shape == (batch2, 1)
    assert jnp.allclose(v2, _ref_bf16(state2, params), atol=2e-3, rtol=2e-3)

    print("KERNEL_OK")
</pallas_src>

<mosaic_0001>
module attributes {stable_mosaic.version = 11 : i64} {
  func.func @_critic_kernel(%arg0: i32, %arg1: memref<8x32xf32, #tpu.memory_space<vmem>>, %arg2: memref<32x64xbf16, #tpu.memory_space<vmem>>, %arg3: memref<1x64xf32, #tpu.memory_space<vmem>>, %arg4: memref<64x32xbf16, #tpu.memory_space<vmem>>, %arg5: memref<1x32xf32, #tpu.memory_space<vmem>>, %arg6: memref<1x32xf32, #tpu.memory_space<vmem>>, %arg7: memref<1xf32, #tpu.memory_space<smem>>, %arg8: memref<1x8x1xf32, #tpu.memory_space<vmem>>) attributes {dimension_semantics = [#tpu.dimension_semantics<parallel>], iteration_bounds = array<i64: 2>, scalar_prefetch = 0 : i64, scratch_operands = 0 : i64, tpu.core_type = #tpu.core_type<tc>, window_params = [{transform_indices = @transform_0, window_bounds = array<i64: 8, 32>}, {pipeline_mode = #tpu.pipeline_mode<synchronous>, transform_indices = @transform_1, window_bounds = array<i64: 32, 64>}, {pipeline_mode = #tpu.pipeline_mode<synchronous>, transform_indices = @transform_2, window_bounds = array<i64: 1, 64>}, {pipeline_mode = #tpu.pipeline_mode<synchronous>, transform_indices = @transform_3, window_bounds = array<i64: 64, 32>}, {pipeline_mode = #tpu.pipeline_mode<synchronous>, transform_indices = @transform_4, window_bounds = array<i64: 1, 32>}, {pipeline_mode = #tpu.pipeline_mode<synchronous>, transform_indices = @transform_5, window_bounds = array<i64: 1, 32>}, {transform_indices = @transform_6, window_bounds = array<i64: 1>}, {transform_indices = @transform_7, window_bounds = array<i64: 1, 8, 1>}]} {
    %c0 = arith.constant 0 : index
    %c0_0 = arith.constant 0 : index
    %0 = vector.load %arg1[%c0, %c0_0] : memref<8x32xf32, #tpu.memory_space<vmem>>, vector<8x32xf32>
    %1 = arith.truncf %0 : vector<8x32xf32> to vector<8x32xbf16>
    %c0_1 = arith.constant 0 : index
    %c0_2 = arith.constant 0 : index
    %2 = vector.load %arg2[%c0_1, %c0_2] : memref<32x64xbf16, #tpu.memory_space<vmem>>, vector<32x64xbf16>
    %cst = arith.constant dense<0.000000e+00> : vector<8x64xf32>
    %3 = tpu.matmul %1, %2, %cst {dimension_numbers = #tpu.dot_dimension_numbers<[1], [0], [0], [1], [0, 0, 1, 1], [], []>} : vector<8x32xbf16>, vector<32x64xbf16>, vector<8x64xf32> -> vector<8x64xf32>
    %c0_3 = arith.constant 0 : index
    %c0_4 = arith.constant 0 : index
    %4 = vector.load %arg3[%c0_3, %c0_4] : memref<1x64xf32, #tpu.memory_space<vmem>>, vector<1x64xf32>
    %5 = vector.broadcast %4 : vector<1x64xf32> to vector<8x64xf32>
    %6 = arith.addf %3, %5 : vector<8x64xf32>
    %cst_5 = arith.constant 0.000000e+00 : f32
    %7 = vector.broadcast %cst_5 : f32 to vector<8x64xf32>
    %8 = arith.maximumf %6, %7 : vector<8x64xf32>
    %9 = arith.truncf %8 : vector<8x64xf32> to vector<8x64xbf16>
    %c0_6 = arith.constant 0 : index
    %c0_7 = arith.constant 0 : index
    %10 = vector.load %arg4[%c0_6, %c0_7] : memref<64x32xbf16, #tpu.memory_space<vmem>>, vector<64x32xbf16>
    %cst_8 = arith.constant dense<0.000000e+00> : vector<8x32xf32>
    %11 = tpu.matmul %9, %10, %cst_8 {dimension_numbers = #tpu.dot_dimension_numbers<[1], [0], [0], [1], [0, 0, 1, 1], [], []>} : vector<8x64xbf16>, vector<64x32xbf16>, vector<8x32xf32> -> vector<8x32xf32>
    %c0_9 = arith.constant 0 : index
    %c0_10 = arith.constant 0 : index
    %12 = vector.load %arg5[%c0_9, %c0_10] : memref<1x32xf32, #tpu.memory_space<vmem>>, vector<1x32xf32>
    %13 = vector.broadcast %12 : vector<1x32xf32> to vector<8x32xf32>
    %14 = arith.addf %11, %13 : vector<8x32xf32>
    %cst_11 = arith.constant 0.000000e+00 : f32
    %15 = vector.broadcast %cst_11 : f32 to vector<8x32xf32>
    %16 = arith.maximumf %14, %15 : vector<8x32xf32>
    %c0_12 = arith.constant 0 : index
    %c0_13 = arith.constant 0 : index
    %17 = vector.load %arg6[%c0_12, %c0_13] : memref<1x32xf32, #tpu.memory_space<vmem>>, vector<1x32xf32>
    %18 = vector.broadcast %17 : vector<1x32xf32> to vector<8x32xf32>
    %19 = arith.mulf %16, %18 : vector<8x32xf32>
    %cst_14 = arith.constant dense<0.000000e+00> : vector<8xf32>
    %20 = vector.multi_reduction <add>, %19, %cst_14 [1] : vector<8x32xf32> to vector<8xf32>
    %21 = vector.shape_cast %20 : vector<8xf32> to vector<8x1xf32>
    %c0_15 = arith.constant 0 : index
    %22 = memref.load %arg7[%c0_15] : memref<1xf32, #tpu.memory_space<smem>>
    %23 = vector.broadcast %22 : f32 to vector<8x1xf32>
    %24 = arith.addf %21, %23 : vector<8x1xf32>
    %25 = vector.shape_cast %24 : vector<8x1xf32> to vector<1x8x1xf32>
    %c0_16 = arith.constant 0 : index
    %c0_17 = arith.constant 0 : index
    %c0_18 = arith.constant 0 : index
    %26 = vector.load %arg8[%c0_16, %c0_17, %c0_18] : memref<1x8x1xf32, #tpu.memory_space<vmem>>, vector<1x8x1xf32>
    tpu.vector_store %arg8[%c0_16, %c0_17, %c0_18], %25 {strides = array<i32>} : memref<1x8x1xf32, #tpu.memory_space<vmem>>, vector<1x8x1xf32>,
    return
  }
  func.func @transform_0(%arg0: i32) -> (i32, i32) {
    %c0_i32 = arith.constant 0 : i32
    %c0_i32_0 = arith.constant 0 : i32
    return %arg0, %c0_i32 : i32, i32
  }
  func.func @transform_1(%arg0: i32) -> (i32, i32) {
    %c0_i32 = arith.constant 0 : i32
    %c0_i32_0 = arith.constant 0 : i32
    %c0_i32_1 = arith.constant 0 : i32
    return %c0_i32, %c0_i32_0 : i32, i32
  }
  func.func @transform_2(%arg0: i32) -> (i32, i32) {
    %c0_i32 = arith.constant 0 : i32
    %c0_i32_0 = arith.constant 0 : i32
    %c0_i32_1 = arith.constant 0 : i32
    return %c0_i32, %c0_i32_0 : i32, i32
  }
  func.func @transform_3(%arg0: i32) -> (i32, i32) {
    %c0_i32 = arith.constant 0 : i32
    %c0_i32_0 = arith.constant 0 : i32
    %c0_i32_1 = arith.constant 0 : i32
    return %c0_i32, %c0_i32_0 : i32, i32
  }
  func.func @transform_4(%arg0: i32) -> (i32, i32) {
    %c0_i32 = arith.constant 0 : i32
    %c0_i32_0 = arith.constant 0 : i32
    %c0_i32_1 = arith.constant 0 : i32
    return %c0_i32, %c0_i32_0 : i32, i32
  }
  func.func @transform_5(%arg0: i32) -> (i32, i32) {
    %c0_i32 = arith.constant 0 : i32
    %c0_i32_0 = arith.constant 0 : i32
    %c0_i32_1 = arith.constant 0 : i32
    return %c0_i32, %c0_i32_0 : i32, i32
  }
  func.func @transform_6(%arg0: i32) -> i32 {
    %c0_i32 = arith.constant 0 : i32
    %c0_i32_0 = arith.constant 0 : i32
    return %c0_i32 : i32
  }
  func.func @transform_7(%arg0: i32) -> (i32, i32, i32) {
    %c0_i32 = arith.constant 0 : i32
    %c0_i32_0 = arith.constant 0 : i32
    %c0_i32_1 = arith.constant 0 : i32
    return %arg0, %c0_i32, %c0_i32_0 : i32, i32, i32
  }
}

</mosaic_0001>

<bundles_post_ra>
// kernel: tpu_custom_call.1
= control target key start
LH: loop header
LB: loop body
LE: loop exit
PB: predicated region body
PF: predicated region fallthrough
CT: control target
= control target key end

     0   :  { %s540_s26 = smov 0   ;;  %s593_s0 = inlined_call_operand.vmem [shape: f32[10,32], index: 0, kind: input, shape index: {}]   ;;  %s594_s1 = inlined_call_operand.vmem [shape: bf16[32,64], index: 1, kind: input, shape index: {}]   ;;  %s595_s2 = inlined_call_operand.vmem [shape: f32[1,64], index: 2, kind: input, shape index: {}]   ;;  %s596_s3 = inlined_call_operand.vmem [shape: bf16[64,32], index: 3, kind: input, shape index: {}]   ;;  %s597_s4 = inlined_call_operand.vmem [shape: f32[1,32], index: 4, kind: input, shape index: {}]   ;;  %s598_s5 = inlined_call_operand.vmem [shape: f32[1,32], index: 5, kind: input, shape index: {}]   ;;  %s599_s6 = inlined_call_operand.<no memory space> [shape: f32[1], index: 6, kind: input, shape index: {}]   ;;  %s600_s7 = inlined_call_operand.vmem [shape: f32[2,8,1], index: 7, kind: output, shape index: {}]  }
   0x1   :  { %12 = sst [smem:[#allocation2]] %s599_s6 }
   0x2 LB: > { %s437_s27 = sadd.s32 4294967295, %s495_s26   ;;  %p441_p0 = scmp.ge.s32.totalorder %s495_s26, 1  ;;  %s495_s26 = sphi %s540_s26, %s18_s26  }
   0x3   : > { %p237_p1 = scmp.lt.s32.totalorder %s495_s26, 3 }
   0x5   : > { %p238_p2 = pnand %p441_p0, %p237_p1 }
   0x6   : > { %p267_p3 = scmp.lt.s32.totalorder (!%p238_p2), %s437_s27, 1  ;;  %s379_s28 = sld [smem:[#allocation2]] (!%p238_p2) }
   0x7   : > { %241 = sbr.rel (%p238_p2) target bundleno = 404 (0x194), region = 48 }
   0xc   : > { %v473_v0 = vld [vmem:[%s594_s1 + $0x8] sm:$0xff]  ;;  %v477_v1 = vld [vmem:[%s596_s3 + $0x18] sm:$0xff]  ;;  %v472_v2 = vld [vmem:[%s594_s1] sm:$0xff]  ;;  %s602_s27 = smov (!%p267_p3, %s437_s27), 1  ;;  %vm298_vm0 = vcmask 261120   ;;  %vm353_vm1 = vcmask 523264   ;;  %v380_v22 = vstv %s379_s28 }
   0xd   : > { %308 = vmatpush.bf16.msra.mxu0 %v473_v0  ;;  %361 = vmatpush.bf16.msra.mxu1 %v477_v1  ;;  %v476_v3 = vld [vmem:[%s596_s3 + $0x10] sm:$0xff]  ;;  %s442_s12 = sshll.u32 %s602_s27, 3  ;;  %v475_v6 = vld [vmem:[%s596_s3 + $0x8] sm:$0xff]  ;;  %v474_v7 = vld [vmem:[%s596_s3] sm:$0xff]  ;;  %vm382_vm2 = vcmask 7168  }
   0xe   : > { %s270_s15 = scalar_lea.vmem %s593_s0, %s442_s12  ;;  %v486_v8 = vld [vmem:[%s595_s2] ss:$0 sm:$0xff]  ;;  %s274_s30 = scalar_lea.vmem %s600_s7, %s442_s12 }
   0xf   : > { %v276_v4 = vld [vmem:[%s270_s15] sm:$0xff] }
  0x10   : > { %v277_v5 = vpack.c.bf16 %v276_v4, %v276_v4  ;;  %v487_v14 = vld [vmem:[%s597_s4] ss:$0 sm:$0xff] }
  0x11   : > { %309 = vmatpush.bf16.msra.mxu0 %v472_v2  ;;  %362 = vmatpush.bf16.msra.mxu1 %v476_v3  ;;  %v488_v17 = vld [vmem:[%s598_s5] ss:$0 sm:$0xff] }
  0x14   : > { %452 = vmatmul.msk.bf16.vlgmr.msra.gmra.mxu0 %vm298_vm0, %v277_v5 }
  0x15   : > { %363 = vmatpush.bf16.msra.mxu1 %v475_v6 }
  0x19   : > { %364 = vmatpush.bf16.msra.mxu1 %v474_v7 }
  0x91   : > { %v311_v9 = vpop.f32.mrf.mxu0 }
  0x92   : > { %v312_v10 = vadd.f32 %v486_v8, %v311_v9 }
  0x94   : > { %v315_v11 = vmax.f32 %v312_v10, 0.0 }
  0x96   : > { %v316_v12 = vpack.c.bf16 %v315_v11, %v315_v11 }
  0x98   : > { %469 = vmatmul.msk.bf16.vlgmr.msra.gmra.mxu1 %vm353_vm1, %v316_v12 }
  0x99   : > { %v313_v13 = vpop.f32.mrf.mxu0 }
 0x115   : > { %v366_v15 = vpop.f32.mrf.mxu1 }
 0x116   : > { %v367_v16 = vadd.f32 %v487_v14, %v366_v15 }
 0x118   : > { %v370_v18 = vmax.f32 %v367_v16, 0.0 }
 0x11a   : > { %v375_v19 = vmul.f32 %v488_v17, %v370_v18 }
 0x11c   : > { %v376_v20 = vsel %vm298_vm0, %v375_v19, 0.0 }
 0x11d   : > { %v368_v21 = vpop.f32.mrf.mxu1  ;;  %377 = vadd.xlane.f32.xlu0 %v376_v20 }
 0x190   : > { %v378_v23 = vpop.xlane.xlu0 %377 }
 0x191   : > { %v381_v24 = vadd.f32 %v380_v22, %v378_v23 }
 0x193   : > { %383 = vst.msk [vmem:[%s274_s30] sm:$0xff] %vm382_vm2, %v381_v24 }
 0x194 PF: > { %s18_s26 = sadd.s32 1, %s495_s26  }
 0x195   : > { %p15_p4 = scmp.ge.s32.totalorder %s18_s26, 4  }
 0x197   :  { %17 = sbr.rel (!%p15_p4) target bundleno = 2 (0x2), region = 78 }

</bundles_post_ra>
